<compile_context>
chip_gen: v5e
topology: v5e:2x2
jax: 0.10.0
libtpu: 0.0.40
codegen_flags: <defaults>
</compile_context>

<pallas_src>
import jax
import jax.numpy as jnp
from jax import lax
from jax.experimental import pallas as pl
from jax.experimental.pallas import tpu as pltpu


def _attention_kernel(out_ref, ctx_ref, w_ref, b_ref, y_ref, attn_ref=None):
    # out_ref : (Bt, L_out, H)   decoder hidden states (batch tile)
    # ctx_ref : (Bt, L_in,  H)   encoder outputs       (batch tile)
    # w_ref   : (2H, H)          pre-transposed Linear weight (rows [:H] -> mix,
    #                            rows [H:] -> output); consumed directly by MXU
    # b_ref   : (1, H)
    # y_ref   : (Bt, L_out, H)
    # attn_ref: (Bt, L_out, L_in) or None (attn writeback skipped)
    w = w_ref[...]          # hoisted: loaded once per grid step
    b = b_ref[...]

    for i in range(out_ref.shape[0]):       # static batch-tile unroll
        q = out_ref[i]                      # (L_out, H)
        c = ctx_ref[i]                      # (L_in,  H)

        # scores = q @ c^T, contracting last dims (no materialized transpose)
        scores = lax.dot_general(
            q, c, (((1,), (1,)), ((), ())),
            preferred_element_type=jnp.float32)          # (L_out, L_in)

        # softmax over the context axis
        m = jnp.max(scores, axis=-1, keepdims=True)
        e = jnp.exp(scores - m)
        denom = jnp.sum(e, axis=-1, keepdims=True)
        attn = e * pl.reciprocal(denom, approx=True)     # EUP vrcp (free slot)
        if attn_ref is not None:
            attn_ref[i] = attn.astype(attn_ref.dtype)

        # mix = attn @ context
        mix = jnp.dot(attn.astype(c.dtype), c,
                      preferred_element_type=jnp.float32)   # (L_out, H)

        # fused projection: tanh([mix, output] @ W^T + b), single K=2H matmul
        combined = jnp.concatenate([mix.astype(q.dtype), q], axis=-1)  # (L_out, 2H)
        pre = jnp.dot(combined, w, preferred_element_type=jnp.float32) + b
        y_ref[i] = jnp.tanh(pre).astype(y_ref.dtype)


def _pick_block_b(B):
    """Fold batch into the block to amortize per-grid-step overhead, but keep
    at least two 'parallel' grid steps when possible (v7x has 2 TCs/chip)."""
    if B <= 1:
        return max(B, 1)
    for d in range(B // 2, 0, -1):
        if B % d == 0:
            return d
    return 1


def attention_forward(output, context, weight, bias, *, block_b=None,
                      return_attn=True):
    """output: (B, L_out, H), context: (B, L_in, H),
       weight: (H, 2H) [PyTorch Linear layout], bias: (H,)"""
    B, L_out, H = output.shape
    _, L_in, _ = context.shape
    assert weight.shape == (H, 2 * H) and bias.shape == (H,)

    if block_b is None:
        block_b = _pick_block_b(B)
    assert B % block_b == 0, "batch must be divisible by block_b"
    grid = (B // block_b,)

    # One-time host-side transpose: kernel consumes W^T directly.
    wt = jnp.asarray(weight).T            # (2H, H)
    b2d = jnp.asarray(bias).reshape(1, H)

    in_specs = [
        pl.BlockSpec((block_b, L_out, H), lambda b: (b, 0, 0)),
        pl.BlockSpec((block_b, L_in, H), lambda b: (b, 0, 0)),
        pl.BlockSpec((2 * H, H), lambda b: (0, 0)),
        pl.BlockSpec((1, H), lambda b: (0, 0)),
    ]
    y_spec = pl.BlockSpec((block_b, L_out, H), lambda b: (b, 0, 0))
    y_shape = jax.ShapeDtypeStruct((B, L_out, H), output.dtype)

    if return_attn:
        out_shape = (y_shape,
                     jax.ShapeDtypeStruct((B, L_out, L_in), output.dtype))
        out_specs = [y_spec,
                     pl.BlockSpec((block_b, L_out, L_in), lambda b: (b, 0, 0))]
    else:
        out_shape = y_shape
        out_specs = y_spec

    result = pl.pallas_call(
        _attention_kernel,
        out_shape=out_shape,
        grid_spec=pltpu.PrefetchScalarGridSpec(
            num_scalar_prefetch=0,
            grid=grid,
            in_specs=in_specs,
            out_specs=out_specs,
        ),
        compiler_params=pltpu.CompilerParams(
            dimension_semantics=("parallel",)),
    )(output, context, wt, b2d)

    if return_attn:
        y, attn = result
        return y, attn
    return result, None


def attention_reference(output, context, weight, bias):
    """Pure-JAX reference mirroring the PyTorch forward."""
    attn = jnp.einsum("bqh,bkh->bqk", output, context)
    attn = jax.nn.softmax(attn, axis=-1)
    mix = jnp.einsum("bqk,bkh->bqh", attn, context)
    combined = jnp.concatenate([mix, output], axis=-1)          # (B, L_out, 2H)
    y = jnp.tanh(combined @ weight.T + bias)                    # Linear(2H -> H)
    return y, attn


if __name__ == "__main__":
    B, L_out, L_in, H = 2, 8, 16, 32   # dim = 32

    key = jax.random.PRNGKey(0)
    k1, k2, k3, k4 = jax.random.split(key, 4)
    output = jax.random.normal(k1, (B, L_out, H), dtype=jnp.float32)
    context = jax.random.normal(k2, (B, L_in, H), dtype=jnp.float32)
    # Deterministic Linear(dim*2, dim) parameters (PyTorch layout: (out, in)).
    weight = jax.random.normal(k3, (H, 2 * H), dtype=jnp.float32) * 0.1
    bias = jax.random.normal(k4, (H,), dtype=jnp.float32) * 0.1

    y, attn = attention_forward(output, context, weight, bias)
    y = jax.block_until_ready(y)
    attn = jax.block_until_ready(attn)

    y_ref, attn_ref = attention_reference(output, context, weight, bias)
    # Slightly looser tolerance than exact f32: the softmax normalizer uses the
    # approximate EUP reciprocal (perf review item). Real bugs would show as
    # O(0.1)+ errors, so this check is still meaningful.
    assert jnp.allclose(attn, attn_ref, atol=5e-3, rtol=5e-3)
    assert jnp.allclose(y, y_ref, atol=5e-3, rtol=5e-3)

    # attn writeback can be skipped entirely when the caller does not need it.
    y_only, _ = attention_forward(output, context, weight, bias,
                                  return_attn=False)
    y_only = jax.block_until_ready(y_only)
    assert jnp.allclose(y_only, y_ref, atol=5e-3, rtol=5e-3)

    print("KERNEL_OK")
</pallas_src>

<mosaic_0001>
module attributes {stable_mosaic.version = 11 : i64} {
  func.func @_attention_kernel(%arg0: i32, %arg1: memref<1x8x32xf32, #tpu.memory_space<vmem>>, %arg2: memref<1x16x32xf32, #tpu.memory_space<vmem>>, %arg3: memref<64x32xf32, #tpu.memory_space<vmem>>, %arg4: memref<1x32xf32, #tpu.memory_space<vmem>>, %arg5: memref<1x8x32xf32, #tpu.memory_space<vmem>>, %arg6: memref<1x8x16xf32, #tpu.memory_space<vmem>>) attributes {dimension_semantics = [#tpu.dimension_semantics<parallel>], iteration_bounds = array<i64: 2>, scalar_prefetch = 0 : i64, scratch_operands = 0 : i64, tpu.core_type = #tpu.core_type<tc>, window_params = [{transform_indices = @transform_0, window_bounds = array<i64: 1, 8, 32>}, {transform_indices = @transform_1, window_bounds = array<i64: 1, 16, 32>}, {pipeline_mode = #tpu.pipeline_mode<synchronous>, transform_indices = @transform_2, window_bounds = array<i64: 64, 32>}, {pipeline_mode = #tpu.pipeline_mode<synchronous>, transform_indices = @transform_3, window_bounds = array<i64: 1, 32>}, {transform_indices = @transform_4, window_bounds = array<i64: 1, 8, 32>}, {transform_indices = @transform_5, window_bounds = array<i64: 1, 8, 16>}]} {
    %c0 = arith.constant 0 : index
    %c0_0 = arith.constant 0 : index
    %0 = vector.load %arg3[%c0, %c0_0] : memref<64x32xf32, #tpu.memory_space<vmem>>, vector<64x32xf32>
    %c0_1 = arith.constant 0 : index
    %c0_2 = arith.constant 0 : index
    %1 = vector.load %arg4[%c0_1, %c0_2] : memref<1x32xf32, #tpu.memory_space<vmem>>, vector<1x32xf32>
    %c0_3 = arith.constant 0 : index
    %c0_4 = arith.constant 0 : index
    %c0_5 = arith.constant 0 : index
    %2 = vector.load %arg1[%c0_3, %c0_4, %c0_5] : memref<1x8x32xf32, #tpu.memory_space<vmem>>, vector<1x8x32xf32>
    %3 = vector.shape_cast %2 : vector<1x8x32xf32> to vector<8x32xf32>
    %c0_6 = arith.constant 0 : index
    %c0_7 = arith.constant 0 : index
    %c0_8 = arith.constant 0 : index
    %4 = vector.load %arg2[%c0_6, %c0_7, %c0_8] : memref<1x16x32xf32, #tpu.memory_space<vmem>>, vector<1x16x32xf32>
    %5 = vector.shape_cast %4 : vector<1x16x32xf32> to vector<16x32xf32>
    %cst = arith.constant dense<0.000000e+00> : vector<8x16xf32>
    %6 = tpu.matmul %3, %5, %cst {dimension_numbers = #tpu.dot_dimension_numbers<[1], [1], [0], [0], [0, 0, 1, 0], [], []>} : vector<8x32xf32>, vector<16x32xf32>, vector<8x16xf32> -> vector<8x16xf32>
    %cst_9 = arith.constant dense<0xFF800000> : vector<8xf32>
    %7 = vector.multi_reduction <maximumf>, %6, %cst_9 [1] : vector<8x16xf32> to vector<8xf32>
    %8 = vector.shape_cast %7 : vector<8xf32> to vector<8x1xf32>
    %9 = vector.broadcast %8 : vector<8x1xf32> to vector<8x16xf32>
    %10 = arith.subf %6, %9 : vector<8x16xf32>
    %11 = math.exp %10 : vector<8x16xf32>
    %cst_10 = arith.constant dense<0.000000e+00> : vector<8xf32>
    %12 = vector.multi_reduction <add>, %11, %cst_10 [1] : vector<8x16xf32> to vector<8xf32>
    %13 = vector.shape_cast %12 : vector<8xf32> to vector<8x1xf32>
    %14 = tpu.reciprocal %13 {approx = true} : vector<8x1xf32> -> vector<8x1xf32>
    %15 = vector.broadcast %14 : vector<8x1xf32> to vector<8x16xf32>
    %16 = arith.mulf %11, %15 : vector<8x16xf32>
    %c0_11 = arith.constant 0 : index
    %c0_12 = arith.constant 0 : index
    %c0_13 = arith.constant 0 : index
    %17 = vector.load %arg6[%c0_11, %c0_12, %c0_13] : memref<1x8x16xf32, #tpu.memory_space<vmem>>, vector<1x8x16xf32>
    %18 = vector.shape_cast %17 : vector<1x8x16xf32> to vector<8x16xf32>
    %19 = vector.shape_cast %16 : vector<8x16xf32> to vector<1x8x16xf32>
    tpu.vector_store %arg6[%c0_11, %c0_12, %c0_13], %19 {strides = array<i32>} : memref<1x8x16xf32, #tpu.memory_space<vmem>>, vector<1x8x16xf32>,
    %cst_14 = arith.constant dense<0.000000e+00> : vector<8x32xf32>
    %20 = tpu.matmul %16, %5, %cst_14 {dimension_numbers = #tpu.dot_dimension_numbers<[1], [0], [0], [1], [0, 0, 1, 1], [], []>} : vector<8x16xf32>, vector<16x32xf32>, vector<8x32xf32> -> vector<8x32xf32>
    %21 = tpu.concatenate %20, %3 in 1 : vector<8x32xf32>, vector<8x32xf32> -> vector<8x64xf32>
    %cst_15 = arith.constant dense<0.000000e+00> : vector<8x32xf32>
    %22 = tpu.matmul %21, %0, %cst_15 {dimension_numbers = #tpu.dot_dimension_numbers<[1], [0], [0], [1], [0, 0, 1, 1], [], []>} : vector<8x64xf32>, vector<64x32xf32>, vector<8x32xf32> -> vector<8x32xf32>
    %23 = vector.broadcast %1 : vector<1x32xf32> to vector<8x32xf32>
    %24 = arith.addf %22, %23 : vector<8x32xf32>
    %25 = math.tanh %24 : vector<8x32xf32>
    %c0_16 = arith.constant 0 : index
    %c0_17 = arith.constant 0 : index
    %c0_18 = arith.constant 0 : index
    %26 = vector.load %arg5[%c0_16, %c0_17, %c0_18] : memref<1x8x32xf32, #tpu.memory_space<vmem>>, vector<1x8x32xf32>
    %27 = vector.shape_cast %26 : vector<1x8x32xf32> to vector<8x32xf32>
    %28 = vector.shape_cast %25 : vector<8x32xf32> to vector<1x8x32xf32>
    tpu.vector_store %arg5[%c0_16, %c0_17, %c0_18], %28 {strides = array<i32>} : memref<1x8x32xf32, #tpu.memory_space<vmem>>, vector<1x8x32xf32>,
    return
  }
  func.func @transform_0(%arg0: i32) -> (i32, i32, i32) {
    %c0_i32 = arith.constant 0 : i32
    %c0_i32_0 = arith.constant 0 : i32
    %c0_i32_1 = arith.constant 0 : i32
    return %arg0, %c0_i32, %c0_i32_0 : i32, i32, i32
  }
  func.func @transform_1(%arg0: i32) -> (i32, i32, i32) {
    %c0_i32 = arith.constant 0 : i32
    %c0_i32_0 = arith.constant 0 : i32
    %c0_i32_1 = arith.constant 0 : i32
    return %arg0, %c0_i32, %c0_i32_0 : i32, i32, i32
  }
  func.func @transform_2(%arg0: i32) -> (i32, i32) {
    %c0_i32 = arith.constant 0 : i32
    %c0_i32_0 = arith.constant 0 : i32
    %c0_i32_1 = arith.constant 0 : i32
    return %c0_i32, %c0_i32_0 : i32, i32
  }
  func.func @transform_3(%arg0: i32) -> (i32, i32) {
    %c0_i32 = arith.constant 0 : i32
    %c0_i32_0 = arith.constant 0 : i32
    %c0_i32_1 = arith.constant 0 : i32
    return %c0_i32, %c0_i32_0 : i32, i32
  }
  func.func @transform_4(%arg0: i32) -> (i32, i32, i32) {
    %c0_i32 = arith.constant 0 : i32
    %c0_i32_0 = arith.constant 0 : i32
    %c0_i32_1 = arith.constant 0 : i32
    return %arg0, %c0_i32, %c0_i32_0 : i32, i32, i32
  }
  func.func @transform_5(%arg0: i32) -> (i32, i32, i32) {
    %c0_i32 = arith.constant 0 : i32
    %c0_i32_0 = arith.constant 0 : i32
    %c0_i32_1 = arith.constant 0 : i32
    return %arg0, %c0_i32, %c0_i32_0 : i32, i32, i32
  }
}

</mosaic_0001>

<bundles_post_ra>
// kernel: tpu_custom_call.1
= control target key start
LH: loop header
LB: loop body
LE: loop exit
PB: predicated region body
PF: predicated region fallthrough
CT: control target
= control target key end

     0   :  { %11 = vsyncpa [#allocation3], 0  ;;  %s847_s0 = inlined_call_operand.vmem [shape: f32[2,8,32], index: 0, kind: input, shape index: {}]   ;;  %s848_s1 = inlined_call_operand.vmem [shape: f32[2,16,32], index: 1, kind: input, shape index: {}]   ;;  %s849_s2 = inlined_call_operand.vmem [shape: f32[64,32], index: 2, kind: input, shape index: {}]   ;;  %s850_s3 = inlined_call_operand.vmem [shape: f32[1,32], index: 3, kind: input, shape index: {}]   ;;  %s851_s4 = inlined_call_operand.hbm [shape: f32[2,8,32], index: 4, kind: output, shape index: {0}]   ;;  %s852_s5 = inlined_call_operand.hbm [shape: f32[2,8,16], index: 5, kind: output, shape index: {1}]  }
   0x1   :  { %13 = vsyncpa [#allocation3 + $0x1], 0 }
   0x2   :  { %14 = vsyncpa [#allocation5], 0 }
   0x3   :  { %16 = vsyncpa [#allocation5 + $0x1], 0  ;;  %s701_s18 = smov 0   ;;  %s703_s19 = smov 0  }
   0x4   :  { %s705_s20 = smov 0   ;;  %s707_s21 = smov 0  }
   0x5 LB: > { %s722_s22 = sadd.s32 4294967295, %s668_s21   ;;  %s501_s23 = sadd.s32 4294967294, %s668_s21   ;;  %s668_s21 = sphi %s707_s21, %s858_s21   ;;  %s664_s20 = sphi %s705_s20, %s857_s20   ;;  %s660_s19 = sphi %s703_s19, %s856_s19   ;;  %s656_s18 = sphi %s701_s18, %s855_s18  }
   0x6   : > { %s726_s24 = sadd.s32 1, %s668_s21   ;;  %s123_s25 = sadd.s32 1, %s664_s20 }
   0x7   : > { %s120_s26 = ssub.s32 %s668_s21, %s726_s24  ;;  %p133_p0 = scmp.ne.s32.totalorder %s664_s20, %s660_s19 }
   0x8   : > { %p121_p1 = scmp.eq.s32.totalorder %s120_s26, 0  ;;  %p134_p2 = scmp.eq.s32.totalorder %s722_s22, 1 }
   0x9   : > { %p139_p3 = scmp.ne.s32.totalorder %s660_s19, %s656_s18  ;;  %p140_p4 = scmp.eq.s32.totalorder %s501_s23, 1 }
   0xa   : > { %s737_s27 = scalar_select %p121_p1, %s664_s20, %s123_s25  }
   0xb   : > { %p739_p5 = por %p134_p2, %p133_p0  ;;  %p743_p6 = por %p140_p4, %p139_p3 }
   0xc   : > { %p504_p7 = scmp.ge.s32.totalorder %s668_s21, 1  ;;  %p205_p8 = scmp.lt.s32.totalorder %s668_s21, 3 }
   0xe   : > { %p206_p9 = pnand %p504_p7, %p205_p8 }
   0xf   : > { %p242_p10 = scmp.lt.s32.totalorder (!%p206_p9), %s722_s22, 1  ;;  %s670_s14 = smov (!%p206_p9), 32  }
  0x10   : > { %209 = sbr.rel (%p206_p9) target bundleno = 684 (0x2ac), region = 36  ;;  %s517_s23 = sshll.u32 (!%p206_p9), %s722_s22, 3 }
  0x15   : > { %s243_s30 = scalar_select %p242_p10, %s722_s22, 1  ;;  %vm263_vm0 = vcmask 261120   ;;  %vm293_vm1 = vcmask 130048   ;;  %v258_v10 = vld [vmem:[%s849_s2 + $0x38] sm:$0xff]  ;;  %v257_v11 = vld [vmem:[%s849_s2 + $0x30] sm:$0xff]  ;;  %v256_v12 = vld [vmem:[%s849_s2 + $0x28] sm:$0xff] }
  0x16   : > { %348 = vmatpush.msra.mxu2 %v258_v10  ;;  %v255_v13 = vld [vmem:[%s849_s2 + $0x20] sm:$0xff]  ;;  %v254_v14 = vld [vmem:[%s849_s2 + $0x18] sm:$0xff]  ;;  %v253_v15 = vld [vmem:[%s849_s2 + $0x10] sm:$0xff]  ;;  %vm336_vm2 = vcmask 523264   ;;  %s594_s22 = scalar_lea.hbm %s852_s5, 16 }
  0x17   : > { %s521_s6 = sshll.u32 %s243_s30, 4  ;;  %s507_s10 = sshll.u32 %s243_s30, 3  ;;  %v252_v16 = vld [vmem:[%s849_s2 + $0x8] sm:$0xff]  ;;  %v251_v20 = vld [vmem:[%s849_s2] sm:$0xff] }
  0x18   : > { %s250_s9 = scalar_lea.vmem %s848_s1, %s521_s6  ;;  %s245_s13 = scalar_lea.vmem %s847_s0, %s507_s10  ;;  %349 = vmatpush.msra.mxu2 %v257_v11 }
  0x19   : > { %v262_v0 = vld [vmem:[%s250_s9 + $0x8] sm:$0xff]  ;;  %v261_v1 = vld [vmem:[%s250_s9] sm:$0xff]  ;;  %s392_s30 = scalar_lea.hbm %s852_s5, %s517_s23 }
  0x1a   : > { %510 = vmatpush.xpose.msk.msra.mxu0 %vm263_vm0, %v262_v0  ;;  %323 = vmatpush.msra.mxu1 %v262_v0  ;;  %v260_v2 = vld [vmem:[%s245_s13] sm:$0xff]  ;;  %s784_s13 = sand.u32 1, %s660_s19   ;;  %s396_s7 = sshll.u32 %s392_s30, 4  ;;  %s397_s7 = int_to_ptr.hbm [resolvable:$true] %s396_s7 }
  0x1b   : > { %329 = vrot.lane.b32.xlu1 %v260_v2, %s670_s14  ;;  %350 = vmatpush.msra.mxu2 %v256_v12  ;;  %s505_s14 = sshll.u32 %s784_s13, 3  ;;  %s368_s8 = scalar_lea.sflag [#allocation5], %s784_s13 }
  0x1c   : > { %324 = vmatpush.msra.mxu1 %v261_v1  ;;  %s241_s15 = scalar_lea.vmem [#allocation4], %s505_s14  ;;  %s588_s9 = sshra.s32 %s397_s7, 4  ;;  %s589_s9 = int_to_ptr.hbm [resolvable:$true] %s588_s9 }
  0x1d   : > { %351 = vmatpush.msra.mxu2 %v255_v13  ;;  %s394_s6 = sshll.u32 %s241_s15, 4  ;;  %s590_s10 = scalar_lea.hbm %s589_s9, 8  ;;  %s395_s6 = int_to_ptr.vmem [resolvable:$true] %s394_s6 }
  0x1e   : > { %511 = vmatpush.xpose.msk.msra.mxu0 %vm263_vm0, %v261_v1  ;;  %p591_p11 = scmp.ne.s32.totalorder %s589_s9, %s590_s10  ;;  %p595_p0 = scmp.lt.s32.totalorder %s589_s9, %s852_s5 }
  0x1f   : > { %352 = vmatpush.msra.mxu2 %v254_v14  ;;  %p596_p1 = scmp.lt.s32.totalorder %s594_s22, %s590_s10 }
  0x20   : > { %p592_p12 = pnand %p591_p11, %p739_p5 }
  0x21   : > { %512 = vmatmul.msk.f32.vlgmr.msra.gmra.mxu0 %vm263_vm0, %v260_v2  ;;  %353 = vmatpush.msra.mxu2 %v253_v15  ;;  %p597_p2 = por %p596_p1, %p595_p0 }
  0x22   : > { %p593_p13 = pneg %p592_p12 }
  0x23   : > { %354 = vmatpush.msra.mxu2 %v252_v16 }
  0x24   : > { %p598_p3 = pnand %p597_p2, %p593_p13 }
  0x25   : > { %355 = vmatpush.msra.mxu2 %v251_v20 }
  0x8d   : > { %v330_v21 = vpop.permute.xlu1 %329 }
  0x9e   : > { %v290_v3 = vpop.f32.mrf.mxu0 }
  0x9f   : > { %v294_v4 = vsel %vm293_vm1, %v290_v3, -inf }
  0xa0   : > { %295 = vmax.xlane.f32.xlu0 %v294_v4 }
 0x113   : > { %v296_v5 = vpop.xlane.xlu0 %295 }
 0x114   : > { %v297_v6 = vsub.f32 %v290_v3, %v296_v5 }
 0x116   : > { %v298_v7 = vmul.f32 1.442695, %v297_v6 }
 0x118   : > { %568 = vpow2.f32 %v298_v7 }
 0x11e   : > { %v569_v8 = vpop.eup %568 }
 0x11f   : > { %v300_v9 = vsel %vm293_vm1, %v569_v8, 0.0 }
 0x120   : > { %301 = vadd.xlane.f32.xlu0 %v300_v9 }
 0x193   : > { %v302_v17 = vpop.xlane.xlu0 %301 }
 0x194   : > { %570 = vrcp.f32 %v302_v17 }
 0x19a   : > { %v571_v18 = vpop.eup %570 }
 0x19b   : > { %v304_v19 = vmul.f32 %v571_v18, %v569_v8 }
 0x19d   : > { %513 = vmatmul.msk.f32.vlgmr.msra.gmra.mxu1 %vm293_vm1, %v304_v19  ;;  %305 = vst.msk [vmem:[%s241_s15] sm:$0xff] %vm293_vm1, %v304_v19 }
 0x21a   : > { %v326_v22 = vpop.f32.mrf.mxu1 }
 0x21b   : > { %v332_v23 = vsel %vm263_vm0, %v326_v22, %v330_v21 }
 0x21c   : > { %514 = vmatmul.msk.f32.vlgmr.msra.gmra.mxu2 %vm336_vm2, %v332_v23 }
 0x21d   : > { %601 = shalt.err (!%p598_p3)
}
 0x21e   : > { %523 = dma.vmem_to_hbm [thread:$0]  (%p739_p5), %s395_s6, 128, %s397_s7, %s368_s8   ;;  %v567_v24 = vld [vmem:[%s850_s3] ss:$0 sm:$0xff] }
 0x21f   : > { %s378_s9 = scalar_lea.hbm %s851_s4, %s517_s23  ;;  %s234_s10 = scalar_lea.vmem [#allocation2], %s505_s14 }
 0x220   : > { %s380_s11 = sshll.u32 %s234_s10, 4  ;;  %s382_s12 = sshll.u32 %s378_s9, 4  ;;  %s381_s11 = int_to_ptr.vmem [resolvable:$true] %s380_s11  ;;  %s383_s12 = int_to_ptr.hbm [resolvable:$true] %s382_s12 }
 0x221   : > { %s363_s6 = scalar_lea.sflag [#allocation3], %s784_s13  ;;  %s616_s7 = sshra.s32 %s383_s12, 4  ;;  %s617_s7 = int_to_ptr.hbm [resolvable:$true] %s616_s7 }
 0x222   : > { %s618_s8 = scalar_lea.hbm %s617_s7, 8  ;;  %s622_s16 = scalar_lea.hbm %s851_s4, 16 }
 0x223   : > { %p619_p4 = scmp.ne.s32.totalorder %s617_s7, %s618_s8  ;;  %p623_p9 = scmp.lt.s32.totalorder %s617_s7, %s851_s4 }
 0x224   : > { %p624_p10 = scmp.lt.s32.totalorder %s622_s16, %s618_s8 }
 0x225   : > { %p620_p7 = pnand %p619_p4, %p739_p5 }
 0x226   : > { %p625_p11 = por %p624_p10, %p623_p9 }
 0x227   : > { %p621_p8 = pneg %p620_p7 }
 0x229   : > { %p626_p12 = pnand %p625_p11, %p621_p8 }
 0x29f   : > { %v357_v25 = vpop.f32.mrf.mxu2 }
 0x2a0   : > { %v358_v26 = vadd.f32 %v567_v24, %v357_v25 }
 0x2a2   : > { %572 = vtanh.f32 %v358_v26 }
 0x2a8   : > { %v573_v27 = vpop.eup %572 }
 0x2a9   : > { %361 = vst.msk [vmem:[%s234_s10] sm:$0xff] %vm263_vm0, %v573_v27 }
 0x2aa   : > { %629 = shalt.err (!%p626_p12)
}
 0x2ab   : > { %522 = dma.vmem_to_hbm [thread:$0]  (%p739_p5), %s381_s11, 128, %s383_s12, %s363_s6  }
 0x2ac PF: > { %p533_p13 = scmp.ge.s32.totalorder %s668_s21, 2  ;;  %s408_s13 = sand.u32 1, %s656_s18  }
 0x2ad   : > { %s409_s15 = scalar_lea.sflag [#allocation3], %s408_s13 }
 0x2ae   : > { %p527_p0 = pnand %p533_p13, %p743_p6 }
 0x2b0   : > { %p528_p1 = pneg %p527_p0 }
 0x2b2   : > { %647 = dma.done.wait (%p528_p1), %s409_s15, 128  }
 0x2b3   : > { %649 = vsyncadd (%p528_p1), %s409_s15, 4294967168  ;;  %s419_s25 = scalar_lea.sflag [#allocation5], %s408_s13 }
 0x2b4   : > { %651 = dma.done.wait (%p528_p1), %s419_s25, 128  }
 0x2b5   : > { %653 = vsyncadd (%p528_p1), %s419_s25, 4294967168  ;;  %p19_p5 = scmp.ge.s32.totalorder %s726_s24, 4   ;;  %s855_s18 = smov %s660_s19 }
 0x2b6   : > { %s856_s19 = smov %s664_s20  ;;  %s857_s20 = smov %s737_s27 }
 0x2b7   : > { %s858_s21 = smov %s726_s24  ;;  %21 = sbr.rel (!%p19_p5) target bundleno = 5 (0x5), region = 91 }
 0x2bc   :  { %425 = vsyncpa [#allocation3], 1 }
 0x2bd   :  { %427 = vsyncpa [#allocation3 + $0x1], 1 }
 0x2be   :  { %428 = vsyncpa [#allocation5], 1 }
 0x2bf   :  { %430 = vsyncpa [#allocation5 + $0x1], 1 }

</bundles_post_ra>
